<compile_context>
chip_gen: v7x
topology: tpu7x:2x2x1
jax: 0.10.0
libtpu: 0.0.40
codegen_flags: <defaults>
</compile_context>

<pallas_src>
import functools

import jax
import jax.numpy as jnp
from jax.experimental import pallas as pl
from jax.experimental.pallas import tpu as pltpu


def _cdiv(a, b):
    return -(-a // b)


def _round_up(n, m):
    return _cdiv(n, m) * m


def mlp_onelayer_kernel(x_ref, w1_ref, b1_ref, w2_ref, b2_ref, o_ref, acc_ref):
    # x_ref : (TB, Dp) f32   | w1_ref: (Dp, TH) bf16 | b1_ref: (1, TH) f32
    # w2_ref: (TH, Cp) bf16  | b2_ref: (1, Cp) f32   | o_ref : (TB, Cp)
    # acc_ref: (TB, Cp) f32 VMEM scratch, carried across the hidden (hk) axis.
    hk = pl.program_id(1)

    @pl.when(hk == 0)
    def _():
        acc_ref[...] = jnp.zeros_like(acc_ref)

    # Cast x to bf16 in-kernel (VPU pack hides under the MXU); f32 accumulate.
    xb = x_ref[...].astype(jnp.bfloat16)
    h = jnp.dot(xb, w1_ref[...], preferred_element_type=jnp.float32)
    h = jnp.maximum(h + b1_ref[...], 0.0)                      # ReLU on the VPU
    acc_ref[...] += jnp.dot(h.astype(jnp.bfloat16), w2_ref[...],
                            preferred_element_type=jnp.float32)

    @pl.when(hk == pl.num_programs(1) - 1)
    def _():
        y = acc_ref[...] + b2_ref[...]
        # sigmoid(y) = 0.5 * (1 + tanh(y / 2)) -> single exact EUP op.
        o_ref[...] = (0.5 * jnp.tanh(0.5 * y) + 0.5).astype(o_ref.dtype)


def prepare_params(w1, b1, w2, b2, *, th=512):
    """Pad + cast the weights ONCE (hoisted out of the per-call path).

    w1: (D_in, H), b1: (1, H) or (H,), w2: (H, C), b2: (1, C) or (C,).
    Weights are stored (in_features, out_features), i.e. the transpose of
    PyTorch's nn.Linear.weight, so the kernel computes plain x @ W.

    Zero padding never changes the result: padded x columns hit zero W1 rows,
    padded hidden columns give relu(0)=0 against zero W2 rows, and padded
    output columns are sliced off by the caller.
    """
    D_in, H = w1.shape
    C = w2.shape[-1]

    Dp = _round_up(D_in, 128)
    Cp = _round_up(C, 128)                      # lane-dense output store
    # Hidden tile TH: multiple of 128, roughly <= th, with Hp = n_h * TH.
    h128 = _round_up(H, 128)
    n_h = _cdiv(h128, max(_round_up(th, 128), 128))
    TH = _round_up(_cdiv(h128, n_h), 128)
    Hp = n_h * TH

    w1p = jnp.pad(w1.astype(jnp.bfloat16), ((0, Dp - D_in), (0, Hp - H)))
    b1p = jnp.pad(jnp.asarray(b1, jnp.float32).reshape(1, H), ((0, 0), (0, Hp - H)))
    w2p = jnp.pad(w2.astype(jnp.bfloat16), ((0, Hp - H), (0, Cp - C)))
    b2p = jnp.pad(jnp.asarray(b2, jnp.float32).reshape(1, C), ((0, 0), (0, Cp - C)))

    meta = dict(D_in=D_in, H=H, C=C, Dp=Dp, Hp=Hp, TH=TH, Cp=Cp)
    return (w1p, b1p, w2p, b2p), meta


def mlp_onelayer_prepared(x, params, meta, *, tb=256, out_dtype=jnp.float32,
                          vmem_limit_bytes=None):
    """Forward pass with pre-padded params (see prepare_params).

    x: (B, D_in) float.  tb: target batch tile (multiple of 8).
    Keep tb >= 256 on v6e/v7x (fills the 256-row MXU and amortizes ~0.35 us
    per grid step); on v5e tb=128 already fills the 128-row MXU, so dropping
    to 128 there is nearly free if VMEM is tight.  If the streamed blocks
    still brush the scoped-VMEM default (v6e: 32 MiB of 128), raise
    vmem_limit_bytes rather than shrinking tb.  For C=1, out_dtype=bf16 halves
    the (padded, 128-lane-dense) output writeback if the consumer tolerates it.
    """
    w1p, b1p, w2p, b2p = params
    D_in, C = meta["D_in"], meta["C"]
    Dp, Hp, TH, Cp = meta["Dp"], meta["Hp"], meta["TH"], meta["Cp"]

    B = x.shape[0]
    # Smallest multiple-of-8 tile that covers B in cdiv(B, tb) tiles (avoids
    # Bp ~ 2*B at awkward batch sizes); >= 2 tiles when B >= 16 so the
    # "parallel" axis can shard across v7x's two TensorCores.
    n_b = max(_cdiv(B, tb), 2 if B >= 16 else 1)
    TB = _round_up(_cdiv(B, n_b), 8)
    Bp = _round_up(B, TB)

    # Only x is padded per call; it stays f32 (cast to bf16 inside the kernel).
    xp = jnp.pad(x.astype(jnp.float32), ((0, Bp - B), (0, Dp - D_in)))

    compiler_kwargs = dict(dimension_semantics=("parallel", "arbitrary"))
    if vmem_limit_bytes is not None:
        compiler_kwargs["vmem_limit_bytes"] = vmem_limit_bytes

    out = pl.pallas_call(
        mlp_onelayer_kernel,
        out_shape=jax.ShapeDtypeStruct((Bp, Cp), out_dtype),
        grid=(Bp // TB, Hp // TH),
        in_specs=[
            pl.BlockSpec((TB, Dp), lambda i, k: (i, 0)),   # x: per batch tile, not re-fetched over hk
            pl.BlockSpec((Dp, TH), lambda i, k: (0, k)),   # W1: streamed over hidden
            pl.BlockSpec((1, TH), lambda i, k: (0, k)),    # b1: streamed over hidden
            pl.BlockSpec((TH, Cp), lambda i, k: (k, 0)),   # W2: streamed over hidden
            pl.BlockSpec((1, Cp), lambda i, k: (0, 0)),    # b2: resident (tiny)
        ],
        out_specs=pl.BlockSpec((TB, Cp), lambda i, k: (i, 0)),
        scratch_shapes=[pltpu.VMEM((TB, Cp), jnp.float32)],   # f32 accumulator
        compiler_params=pltpu.CompilerParams(**compiler_kwargs),
    )(xp, w1p, b1p, w2p, b2p)

    return out[:B, :C]


def mlp_onelayer(x, w1, b1, w2, b2, *, tb=256, th=512, out_dtype=jnp.float32,
                 vmem_limit_bytes=None):
    """Convenience one-shot wrapper.  For repeated calls with the same weights,
    call prepare_params() once and reuse mlp_onelayer_prepared()."""
    params, meta = prepare_params(w1, b1, w2, b2, th=th)
    return mlp_onelayer_prepared(x, params, meta, tb=tb, out_dtype=out_dtype,
                                 vmem_limit_bytes=vmem_limit_bytes)


def init_params(key, input_size, nhidden, out_channels):
    """Deterministic init mimicking torch.nn.Linear (uniform +/- 1/sqrt(fan_in))."""
    k1, k2, k3, k4 = jax.random.split(key, 4)
    bound1 = 1.0 / jnp.sqrt(input_size)
    bound2 = 1.0 / jnp.sqrt(nhidden)
    w1 = jax.random.uniform(k1, (input_size, nhidden), jnp.float32, -bound1, bound1)
    b1 = jax.random.uniform(k2, (1, nhidden), jnp.float32, -bound1, bound1)
    w2 = jax.random.uniform(k3, (nhidden, out_channels), jnp.float32, -bound2, bound2)
    b2 = jax.random.uniform(k4, (1, out_channels), jnp.float32, -bound2, bound2)
    return w1, b1, w2, b2


if __name__ == "__main__":
    # Small shapes consistent with the module: batch=8, input_size=32,
    # nhidden=64 (module default), out_channels=1 (module default).
    batch, input_size, nhidden, out_channels = 8, 32, 64, 1

    key = jax.random.PRNGKey(0)
    kx, kp = jax.random.split(key)
    x = jax.random.normal(kx, (batch, input_size), jnp.float32)
    w1, b1, w2, b2 = init_params(kp, input_size, nhidden, out_channels)

    # Pad/cast weights once (hoisted out of the per-call path); jit over x only.
    params, meta = prepare_params(w1, b1, w2, b2)
    fwd = jax.jit(lambda xx: mlp_onelayer_prepared(xx, params, meta))
    out = jax.block_until_ready(fwd(x))
    assert out.shape == (batch, out_channels)

    # Reference matching the kernel's bf16-operand / f32-accumulate path.
    xb, w1b, w2b = (a.astype(jnp.bfloat16) for a in (x, w1, w2))
    h_ref = jnp.maximum(
        jnp.dot(xb, w1b, preferred_element_type=jnp.float32) + b1, 0.0)
    y_ref = jnp.dot(h_ref.astype(jnp.bfloat16), w2b,
                    preferred_element_type=jnp.float32) + b2
    ref = jax.nn.sigmoid(y_ref)
    assert jnp.allclose(out, ref, atol=2e-3, rtol=2e-3)

    # Loose check against the full-f32 PyTorch-equivalent forward.
    # TODO(synk): use f32 (or bf16x3) matmuls if strict f32 parity is required.
    ref_f32 = jax.nn.sigmoid(jnp.maximum(x @ w1 + b1, 0.0) @ w2 + b2)
    assert jnp.allclose(out, ref_f32, atol=2e-2, rtol=2e-2)

    print("KERNEL_OK")
</pallas_src>

<mosaic_0001>
module attributes {stable_mosaic.version = 11 : i64} {
  func.func @mlp_onelayer_kernel(%arg0: i32, %arg1: i32, %arg2: memref<8x128xf32, #tpu.memory_space<vmem>>, %arg3: memref<128x128xbf16, #tpu.memory_space<vmem>>, %arg4: memref<1x128xf32, #tpu.memory_space<vmem>>, %arg5: memref<128x128xbf16, #tpu.memory_space<vmem>>, %arg6: memref<1x128xf32, #tpu.memory_space<vmem>>, %arg7: memref<8x128xf32, #tpu.memory_space<vmem>>, %arg8: memref<8x128xf32, #tpu.memory_space<vmem>>) attributes {dimension_semantics = [#tpu.dimension_semantics<parallel>, #tpu.dimension_semantics<arbitrary>], iteration_bounds = array<i64: 1, 1>, scalar_prefetch = 0 : i64, scratch_operands = 1 : i64, tpu.core_type = #tpu.core_type<tc>, window_params = [{transform_indices = @transform_0, window_bounds = array<i64: 8, 128>}, {transform_indices = @transform_1, window_bounds = array<i64: 128, 128>}, {transform_indices = @transform_2, window_bounds = array<i64: 1, 128>}, {transform_indices = @transform_3, window_bounds = array<i64: 128, 128>}, {pipeline_mode = #tpu.pipeline_mode<synchronous>, transform_indices = @transform_4, window_bounds = array<i64: 1, 128>}, {transform_indices = @transform_5, window_bounds = array<i64: 8, 128>}]} {
    %c0_i32 = arith.constant 0 : i32
    %0 = arith.cmpi eq, %arg1, %c0_i32 : i32
    %1 = arith.extui %0 : i1 to i32
    %c0_i32_0 = arith.constant 0 : i32
    %2 = arith.cmpi ne, %1, %c0_i32_0 : i32
    scf.if %2 {
      %cst_16 = arith.constant 0.000000e+00 : f32
      %21 = vector.broadcast %cst_16 : f32 to vector<8x128xf32>
      %c0_17 = arith.constant 0 : index
      %c0_18 = arith.constant 0 : index
      %22 = vector.load %arg8[%c0_17, %c0_18] : memref<8x128xf32, #tpu.memory_space<vmem>>, vector<8x128xf32>
      tpu.vector_store %arg8[%c0_17, %c0_18], %21 {strides = array<i32>} : memref<8x128xf32, #tpu.memory_space<vmem>>, vector<8x128xf32>,
    } else {
    }
    %c0 = arith.constant 0 : index
    %c0_1 = arith.constant 0 : index
    %3 = vector.load %arg2[%c0, %c0_1] : memref<8x128xf32, #tpu.memory_space<vmem>>, vector<8x128xf32>
    %4 = arith.truncf %3 : vector<8x128xf32> to vector<8x128xbf16>
    %c0_2 = arith.constant 0 : index
    %c0_3 = arith.constant 0 : index
    %5 = vector.load %arg3[%c0_2, %c0_3] : memref<128x128xbf16, #tpu.memory_space<vmem>>, vector<128x128xbf16>
    %cst = arith.constant dense<0.000000e+00> : vector<8x128xf32>
    %6 = tpu.matmul %4, %5, %cst {dimension_numbers = #tpu.dot_dimension_numbers<[1], [0], [0], [1], [0, 0, 1, 1], [], []>} : vector<8x128xbf16>, vector<128x128xbf16>, vector<8x128xf32> -> vector<8x128xf32>
    %c0_4 = arith.constant 0 : index
    %c0_5 = arith.constant 0 : index
    %7 = vector.load %arg4[%c0_4, %c0_5] : memref<1x128xf32, #tpu.memory_space<vmem>>, vector<1x128xf32>
    %8 = vector.broadcast %7 : vector<1x128xf32> to vector<8x128xf32>
    %9 = arith.addf %6, %8 : vector<8x128xf32>
    %cst_6 = arith.constant 0.000000e+00 : f32
    %10 = vector.broadcast %cst_6 : f32 to vector<8x128xf32>
    %11 = arith.maximumf %9, %10 : vector<8x128xf32>
    %c0_7 = arith.constant 0 : index
    %c0_8 = arith.constant 0 : index
    %12 = vector.load %arg8[%c0_7, %c0_8] : memref<8x128xf32, #tpu.memory_space<vmem>>, vector<8x128xf32>
    %13 = arith.truncf %11 : vector<8x128xf32> to vector<8x128xbf16>
    %c0_9 = arith.constant 0 : index
    %c0_10 = arith.constant 0 : index
    %14 = vector.load %arg5[%c0_9, %c0_10] : memref<128x128xbf16, #tpu.memory_space<vmem>>, vector<128x128xbf16>
    %cst_11 = arith.constant dense<0.000000e+00> : vector<8x128xf32>
    %15 = tpu.matmul %13, %14, %cst_11 {dimension_numbers = #tpu.dot_dimension_numbers<[1], [0], [0], [1], [0, 0, 1, 1], [], []>} : vector<8x128xbf16>, vector<128x128xbf16>, vector<8x128xf32> -> vector<8x128xf32>
    %16 = arith.addf %12, %15 : vector<8x128xf32>
    %c0_12 = arith.constant 0 : index
    %c0_13 = arith.constant 0 : index
    %17 = vector.load %arg8[%c0_12, %c0_13] : memref<8x128xf32, #tpu.memory_space<vmem>>, vector<8x128xf32>
    tpu.vector_store %arg8[%c0_12, %c0_13], %16 {strides = array<i32>} : memref<8x128xf32, #tpu.memory_space<vmem>>, vector<8x128xf32>,
    %c0_i32_14 = arith.constant 0 : i32
    %18 = arith.cmpi eq, %arg1, %c0_i32_14 : i32
    %19 = arith.extui %18 : i1 to i32
    %c0_i32_15 = arith.constant 0 : i32
    %20 = arith.cmpi ne, %19, %c0_i32_15 : i32
    scf.if %20 {
      %c0_16 = arith.constant 0 : index
      %c0_17 = arith.constant 0 : index
      %21 = vector.load %arg8[%c0_16, %c0_17] : memref<8x128xf32, #tpu.memory_space<vmem>>, vector<8x128xf32>
      %c0_18 = arith.constant 0 : index
      %c0_19 = arith.constant 0 : index
      %22 = vector.load %arg6[%c0_18, %c0_19] : memref<1x128xf32, #tpu.memory_space<vmem>>, vector<1x128xf32>
      %23 = vector.broadcast %22 : vector<1x128xf32> to vector<8x128xf32>
      %24 = arith.addf %21, %23 : vector<8x128xf32>
      %cst_20 = arith.constant 5.000000e-01 : f32
      %25 = vector.broadcast %cst_20 : f32 to vector<8x128xf32>
      %26 = arith.mulf %25, %24 : vector<8x128xf32>
      %27 = math.tanh %26 : vector<8x128xf32>
      %cst_21 = arith.constant 5.000000e-01 : f32
      %28 = vector.broadcast %cst_21 : f32 to vector<8x128xf32>
      %29 = arith.mulf %28, %27 : vector<8x128xf32>
      %cst_22 = arith.constant 5.000000e-01 : f32
      %30 = vector.broadcast %cst_22 : f32 to vector<8x128xf32>
      %31 = arith.addf %29, %30 : vector<8x128xf32>
      %c0_23 = arith.constant 0 : index
      %c0_24 = arith.constant 0 : index
      %32 = vector.load %arg7[%c0_23, %c0_24] : memref<8x128xf32, #tpu.memory_space<vmem>>, vector<8x128xf32>
      tpu.vector_store %arg7[%c0_23, %c0_24], %31 {strides = array<i32>} : memref<8x128xf32, #tpu.memory_space<vmem>>, vector<8x128xf32>,
    } else {
    }
    return
  }
  func.func @transform_0(%arg0: i32, %arg1: i32) -> (i32, i32) {
    %c0_i32 = arith.constant 0 : i32
    %c0_i32_0 = arith.constant 0 : i32
    return %arg0, %c0_i32 : i32, i32
  }
  func.func @transform_1(%arg0: i32, %arg1: i32) -> (i32, i32) {
    %c0_i32 = arith.constant 0 : i32
    %c0_i32_0 = arith.constant 0 : i32
    return %c0_i32, %arg1 : i32, i32
  }
  func.func @transform_2(%arg0: i32, %arg1: i32) -> (i32, i32) {
    %c0_i32 = arith.constant 0 : i32
    %c0_i32_0 = arith.constant 0 : i32
    return %c0_i32, %arg1 : i32, i32
  }
  func.func @transform_3(%arg0: i32, %arg1: i32) -> (i32, i32) {
    %c0_i32 = arith.constant 0 : i32
    %c0_i32_0 = arith.constant 0 : i32
    return %arg1, %c0_i32 : i32, i32
  }
  func.func @transform_4(%arg0: i32, %arg1: i32) -> (i32, i32) {
    %c0_i32 = arith.constant 0 : i32
    %c0_i32_0 = arith.constant 0 : i32
    %c0_i32_1 = arith.constant 0 : i32
    return %c0_i32, %c0_i32_0 : i32, i32
  }
  func.func @transform_5(%arg0: i32, %arg1: i32) -> (i32, i32) {
    %c0_i32 = arith.constant 0 : i32
    %c0_i32_0 = arith.constant 0 : i32
    return %arg0, %c0_i32 : i32, i32
  }
}

</mosaic_0001>

<bundles_post_ra>
// kernel: _lambda_.1
= control target key start
LH: loop header
LB: loop body
LE: loop exit
PB: predicated region body
PF: predicated region fallthrough
CT: control target
= control target key end

     0   :  { %10 = vsyncpa [#allocation4], 0  ;;  %s519_s0 = inlined_call_operand.vmem [shape: f32[8,128], index: 0, kind: input, shape index: {}]   ;;  %s520_s1 = inlined_call_operand.hbm [shape: bf16[128,128], index: 1, kind: input, shape index: {}]   ;;  %s521_s2 = inlined_call_operand.vmem [shape: f32[1,128], index: 2, kind: input, shape index: {}]   ;;  %s522_s3 = inlined_call_operand.hbm [shape: bf16[128,128], index: 3, kind: input, shape index: {}]   ;;  %s523_s4 = inlined_call_operand.vmem [shape: f32[1,128], index: 4, kind: input, shape index: {}]   ;;  %s524_s5 = inlined_call_operand.vmem [shape: f32[8,128], index: 5, kind: output, shape index: {}]  }
   0x1   :  { %11 = vsyncpa [#allocation6], 0  ;;  %s447_s18 = smov [#allocation3]   ;;  %s399_s22 = scalar_lea.hbm %s520_s1, 1024 }
   0x2   :  { %s19_s19 = sshll.u32 %s447_s18, 4  ;;  %p400_p0 = scmp.ne.s32.totalorder %s520_s1, %s399_s22  ;;  %s20_s19 = int_to_ptr.vmem [resolvable:$true] %s19_s19 }
   0x3   :  { %p403_p1 = scmp.lt.u32.totalorder %s399_s22, %s520_s1 }
   0x5   :  { %p405_p2 = pnand %p403_p1, %p400_p0 }
   0x7   :  { %408 = shalt.err (!%p405_p2)
}
   0x8   :  { %s409_s27 = scalar_lea.vmem %s20_s19, 1024  ;;  %p414_p4 = scmp.lt.s32.totalorder %s20_s19, %s20_s19 }
   0x9   :  { %p410_p3 = scmp.ne.s32.totalorder %s20_s19, %s409_s27  ;;  %p415_p5 = scmp.lt.s32.totalorder %s409_s27, %s409_s27 }
   0xb   :  { %p416_p6 = por %p415_p5, %p414_p4 }
   0xd   :  { %p417_p7 = pnand %p416_p6, %p410_p3 }
   0xf   :  { %420 = shalt.err (!%p417_p7)
}
  0x10   :  { %s448_s28 = smov 64   ;;  %s449_s29 = smov 4  }
  0x11   :  { %25 = dma.hbm_to_vmem [thread:$0]  %s520_s1, 1024, %s20_s19, [#allocation4], %s448_s28, %s448_s28, %s449_s29  }
  0x12   :  { %s450_s7 = smov [#allocation5]   ;;  %s421_s11 = scalar_lea.hbm %s522_s3, 1024 }
  0x13   :  { %s33_s8 = sshll.u32 %s450_s7, 4  ;;  %p422_p8 = scmp.ne.s32.totalorder %s522_s3, %s421_s11  ;;  %s34_s8 = int_to_ptr.vmem [resolvable:$true] %s33_s8 }
  0x14   :  { %p425_p9 = scmp.lt.u32.totalorder %s421_s11, %s522_s3 }
  0x16   :  { %p427_p10 = pnand %p425_p9, %p422_p8 }
  0x18   :  { %430 = shalt.err (!%p427_p10)
}
  0x19   :  { %s431_s16 = scalar_lea.vmem %s34_s8, 1024  ;;  %p436_p12 = scmp.lt.s32.totalorder %s34_s8, %s34_s8 }
  0x1a   :  { %p432_p11 = scmp.ne.s32.totalorder %s34_s8, %s431_s16  ;;  %p437_p13 = scmp.lt.s32.totalorder %s431_s16, %s431_s16 }
  0x1c   :  { %p438_p0 = por %p437_p13, %p436_p12 }
  0x1e   :  { %p439_p1 = pnand %p438_p0, %p432_p11 }
  0x20   :  { %442 = shalt.err (!%p439_p1)
}
  0x21   :  { %39 = dma.hbm_to_vmem [thread:$0]  %s522_s3, 1024, %s34_s8, [#allocation6], %s448_s28, %s448_s28, %s449_s29  }
  0x22   :  { %443 = dma.done.wait [#allocation4], 1024  }
  0x23   :  { %444 = vsyncadd [#allocation4], 4294966272 }
  0x24   :  { %445 = dma.done.wait [#allocation6], 1024  }
  0x25   :  { %446 = vsyncadd [#allocation6], 4294966272  ;;  %v451_v0 = vmov 0.0   ;;  %vm452_vm0 = vmmov 0   ;;  %v381_v1 = vld [vmem:[#allocation3] sm:$0xff]   ;;  %v382_v2 = vld [vmem:[#allocation3 + $0x8] sm:$0xff]  }
  0x26   :  { %335 = vmatprep.subr.bf16.mxu0 %v451_v0  ;;  %351 = vmatprep.mubr.msk.bf16.mxu0 %vm452_vm0, %v451_v0  ;;  %v383_v3 = vld [vmem:[#allocation3 + $0x10] sm:$0xff]   ;;  %v389_v4 = vld [vmem:[#allocation5] sm:$0xff]   ;;  %v384_v5 = vld [vmem:[#allocation3 + $0x18] sm:$0xff]  }
  0x27   :  { %355 = vmatprep.subr.bf16.mxu1 %v451_v0  ;;  %371 = vmatprep.mubr.msk.bf16.mxu1 %vm452_vm0, %v451_v0  ;;  %v390_v6 = vld [vmem:[#allocation5 + $0x8] sm:$0xff]   ;;  %v385_v7 = vld [vmem:[#allocation3 + $0x20] sm:$0xff]   ;;  %v391_v8 = vld [vmem:[#allocation5 + $0x10] sm:$0xff]  }
  0x28   :  { %336 = vmatpush3.bf16.msra.mxu0 %v381_v1  ;;  %356 = vmatpush3.bf16.msra.mxu1 %v389_v4  ;;  %v386_v9 = vld [vmem:[#allocation3 + $0x28] sm:$0xff]   ;;  %v392_v10 = vld [vmem:[#allocation5 + $0x18] sm:$0xff]   ;;  %v387_v11 = vld [vmem:[#allocation3 + $0x30] sm:$0xff]  }
  0x29   :  { %337 = vmatprep.subr.bf16.mxu0 %v451_v0  ;;  %357 = vmatprep.subr.bf16.mxu1 %v451_v0  ;;  %v393_v12 = vld [vmem:[#allocation5 + $0x20] sm:$0xff]   ;;  %v388_v13 = vld [vmem:[#allocation3 + $0x38] sm:$0xff]   ;;  %v394_v15 = vld [vmem:[#allocation5 + $0x28] sm:$0xff]  }
  0x2a   :  { %v54_v14 = vld [vmem:[%s519_s0] sm:$0xff]  ;;  %v395_v17 = vld [vmem:[#allocation5 + $0x30] sm:$0xff]   ;;  %v396_v18 = vld [vmem:[#allocation5 + $0x38] sm:$0xff]  }
  0x2b   :  { %v55_v16 = vpack.c.bf16 %v54_v14, %v54_v14  ;;  %v299_v19 = vld [vmem:[%s521_s2] ss:$0 sm:$0xff] }
  0x2c   :  { %338 = vmatpush3.bf16.msra.mxu0 %v382_v2  ;;  %358 = vmatpush3.bf16.msra.mxu1 %v390_v6  ;;  %v316_v27 = vld [vmem:[%s523_s4] ss:$0 sm:$0xff] }
  0x2d   :  { %339 = vmatprep.subr.bf16.mxu0 %v451_v0  ;;  %359 = vmatprep.subr.bf16.mxu1 %v451_v0 }
  0x30   :  { %340 = vmatpush3.bf16.msra.mxu0 %v383_v3  ;;  %360 = vmatpush3.bf16.msra.mxu1 %v391_v8 }
  0x31   :  { %341 = vmatprep.subr.bf16.mxu0 %v451_v0  ;;  %361 = vmatprep.subr.bf16.mxu1 %v451_v0 }
  0x34   :  { %342 = vmatpush3.bf16.msra.mxu0 %v384_v5  ;;  %362 = vmatpush3.bf16.msra.mxu1 %v392_v10 }
  0x35   :  { %343 = vmatprep.subr.bf16.mxu0 %v451_v0  ;;  %363 = vmatprep.subr.bf16.mxu1 %v451_v0 }
  0x38   :  { %344 = vmatpush3.bf16.msra.mxu0 %v385_v7  ;;  %364 = vmatpush3.bf16.msra.mxu1 %v393_v12 }
  0x39   :  { %345 = vmatprep.subr.bf16.mxu0 %v451_v0  ;;  %365 = vmatprep.subr.bf16.mxu1 %v451_v0 }
  0x3c   :  { %346 = vmatpush3.bf16.msra.mxu0 %v386_v9  ;;  %366 = vmatpush3.bf16.msra.mxu1 %v394_v15 }
  0x3d   :  { %347 = vmatprep.subr.bf16.mxu0 %v451_v0  ;;  %367 = vmatprep.subr.bf16.mxu1 %v451_v0 }
  0x40   :  { %348 = vmatpush3.bf16.msra.mxu0 %v387_v11  ;;  %368 = vmatpush3.bf16.msra.mxu1 %v395_v17 }
  0x41   :  { %349 = vmatprep.subr.bf16.mxu0 %v451_v0  ;;  %369 = vmatprep.subr.bf16.mxu1 %v451_v0 }
  0x44   :  { %350 = vmatpush3.bf16.msra.mxu0 %v388_v13  ;;  %370 = vmatpush3.bf16.msra.mxu1 %v396_v18 }
  0x47   :  { %352 = vmatmul.mubr.bf16.vlgmr.msra.gmra.mrb[0].mxu0 %v55_v16 }
 0x11a   :  { %v161_v20 = vpop.f32.mrb[0].mxu0 }
 0x11b   :  { %v162_v21 = vadd.f32 %v299_v19, %v161_v20  ;;  %v353_v22 = vpop.f32.mrb[1].mxu0 }
 0x11c   :  { %v164_v23 = vpop.f32.mrb[2].mxu0 }
 0x11d   :  { %v167_v24 = vmax.f32 %v162_v21, 0.0  ;;  %v354_v25 = vpop.f32.mrb[3].mxu0 }
 0x11f   :  { %v169_v26 = vpack.c.bf16 %v167_v24, %v167_v24 }
 0x121   :  { %372 = vmatmul.mubr.bf16.vlgmr.msra.gmra.mrb[0].mxu1 %v169_v26 }
 0x1f4   :  { %v268_v28 = vpop.f32.mrb[0].mxu1 }
 0x1f5   :  { %v287_v29 = vadd.f32 %v316_v27, %v268_v28  ;;  %v373_v30 = vpop.f32.mrb[1].mxu1 }
 0x1f6   :  { %v271_v31 = vpop.f32.mrb[2].mxu1 }
 0x1f7   :  { %v288_v32 = vmul.f32 0.5, %v287_v29  ;;  %v374_v33 = vpop.f32.mrb[3].mxu1 }
 0x1f9   :  { %397 = vtanh.f32 %v288_v32 }
 0x203   :  { %v398_v34 = vpop.eup %397 }
 0x204   :  { %v290_v35 = vmul.f32 0.5, %v398_v34 }
 0x206   :  { %v291_v36 = vadd.f32 0.5, %v290_v35 }
 0x208   :  { %292 = vst [vmem:[%s524_s5] sm:$0xff] %v291_v36 }
 0x209   :  { %297 = vsyncpa [#allocation4], 1 }
 0x20a   :  { %298 = vsyncpa [#allocation6], 1 }

</bundles_post_ra>
